<compile_context>
chip_gen: v7x
topology: tpu7x:2x2x1
jax: 0.10.0
libtpu: 0.0.40
codegen_flags: <defaults>
</compile_context>

<pallas_src>
import functools

import jax
import jax.numpy as jnp
import numpy as np
from jax.experimental import pallas as pl
from jax.experimental.pallas import tpu as pltpu


def _weighted_attention_kernel(x_ref, w1_ref, b1_ref, w2_ref, out_ref, wts_ref,
                               *, bf16_matmul):
    """One (Bb, S, D) slab of batch rows per grid step.

    x_ref  : (Bb, S, D) bf16  input tile (streamed in bf16 to halve HBM bytes)
    w1_ref : (D, H)           first projection weight (bf16 if bf16_matmul else f32)
    b1_ref : (1, H)  f32      first projection bias
    w2_ref : (1, H)  f32      second projection weight stored as a row
    out_ref: (Bb, D) f32      weighted-sum output
    wts_ref: (Bb, S) f32      attention weights output
    """
    Bb, S, D = x_ref.shape
    H = w1_ref.shape[1]

    x_bf = x_ref[...]                                # (Bb, S, D) bf16
    # f32 copy for the softmax-weighted sum (v5e VPU has no bf16; VPU slot has slack).
    xf = x_bf.astype(jnp.float32)

    # ---- Linear(D->H) + ReLU as one (Bb*S, D) @ (D, H) MXU matmul ----
    if bf16_matmul:
        # S % 16 == 0: merging (Bb, S) on the sublane axis of the bf16 tile is free.
        x2 = x_bf.reshape(Bb * S, D)
    else:
        # S not bf16-aligned: reshape the f32 upcast instead (free when S % 8 == 0)
        # and run the matmul in f32 — fine, the kernel is HBM-bound at small H.
        x2 = xf.reshape(Bb * S, D)
    h = jnp.dot(x2, w1_ref[...], preferred_element_type=jnp.float32)
    h = jnp.maximum(h + b1_ref[...], 0.0)            # (Bb*S, H) f32
    h = h.reshape(Bb, S, H)

    # ---- Linear(H->1) as VPU multiply + lane reduce (no N=1 matmul). ----
    # b2 omitted: softmax over S is invariant to adding a constant.
    e = jnp.sum(h * w2_ref[...], axis=-1)            # (Bb, S) f32

    # ---- softmax over the sequence (lane) axis, in f32 ----
    m = jnp.max(e, axis=1, keepdims=True)            # (Bb, 1)
    p = jnp.exp(e - m)                               # (Bb, S)
    denom = jnp.sum(p, axis=1, keepdims=True)        # (Bb, 1)
    w = p * pl.reciprocal(denom)                     # exact; (Bb,1) op is noise
    wts_ref[...] = w.astype(wts_ref.dtype)

    # ---- weighted sum over sequence: VPU multiply + sublane reduce ----
    # The VMEM budget below reserves a full f32 tile in case Mosaic materializes
    # the broadcasted product.
    # TODO(synk): if bundle dumps show a full-tile product copy, rewrite as an
    # S-loop accumulate into a (Bb, D) f32 accumulator.
    out_ref[...] = jnp.sum(xf * w[:, :, None], axis=1).astype(out_ref.dtype)


def _vmem_budget_bytes():
    """(soft budget, hard cap) derived from this generation's VMEM capacity."""
    try:
        cap = int(pltpu.get_tpu_info().vmem_capacity_bytes)
    except Exception:
        cap = 64 << 20            # assume the smallest per-core VMEM (v7x)
    return int(cap * 0.70), int(cap * 0.75)


def _pick_batch_block(B, S, D, H, mm_bytes, budget_bytes, hard_cap_bytes):
    """Pick Bb (multiple of 8) by VMEM bytes, and the vmem_limit to request."""
    rup8 = lambda v: ((v + 7) // 8) * 8
    # Conservative per-batch-row VMEM bytes inside one grid step:
    #   2x bf16 x tile (double buffer)         : 2 * S*D*2
    #   f32 upcast + possible product temp     : 2 * S*D*4
    #   h intermediate (f32)                   : S*H*4
    #   softmax vectors + 2x output tiles      : ~12 * (S + D)
    row = 2 * S * D * 2 + 2 * S * D * 4 + S * H * 4 + 12 * (S + D)
    # Constant inputs are still double-buffered by the pipeline: charge 2x w1.
    fixed = 2 * D * H * mm_bytes + 16 * H + (2 << 20)   # 2x w1 + b1/w2 + Mosaic slack
    avail = max(budget_bytes - fixed, 8 * row)
    bb = max(8, (avail // row) // 8 * 8)
    bb = min(bb, rup8(B))                     # never pad past one block of rows
    if B > 8:
        bb = min(bb, rup8(-(-B // 2)))        # >= 2 grid steps: keep both v7x TCs busy
    est = fixed + bb * row
    vmem_limit = int(min(max(budget_bytes, est * 1.25), hard_cap_bytes))
    return int(bb), vmem_limit


def weighted_attention(x, w1, b1, w2, b2=None):
    """x: (B, S, D) float32. Returns (outputs (B, D) f32, weights (B, S) f32).

    b2 is accepted for API parity with the PyTorch module but is mathematically a
    no-op under the softmax (shift invariance) and is not sent to the kernel.
    """
    B, S, D = x.shape
    H = w1.shape[1]

    # bf16 MXU path only when the (Bb,S)->(Bb*S) merge is sublane-aligned for bf16.
    mm_dtype = jnp.bfloat16 if (S % 16 == 0) else jnp.float32
    mm_bytes = 2 if mm_dtype == jnp.bfloat16 else 4

    budget, hard_cap = _vmem_budget_bytes()
    Bb, vmem_limit = _pick_batch_block(B, S, D, H, mm_bytes, budget, hard_cap)
    n_steps = -(-B // Bb)
    B_pad = n_steps * Bb

    # Stream x in bf16 (the only large operand; halves HBM bytes).
    x_bf = x.astype(jnp.bfloat16)
    if B_pad != B:
        # Zero padding is safe: padded rows yield uniform weights and zero outputs
        # and are sliced off below.
        x_bf = jnp.pad(x_bf, ((0, B_pad - B), (0, 0), (0, 0)))

    w1_c = w1.astype(mm_dtype)
    b1_2d = b1.reshape(1, H).astype(jnp.float32)
    w2_row = w2.reshape(1, H).astype(jnp.float32)   # (H,1) column -> (1,H) row

    out_shapes = (
        jax.ShapeDtypeStruct((B_pad, D), jnp.float32),
        jax.ShapeDtypeStruct((B_pad, S), jnp.float32),
    )

    kernel = functools.partial(_weighted_attention_kernel,
                               bf16_matmul=(mm_dtype == jnp.bfloat16))

    outputs, weights = pl.pallas_call(
        kernel,
        out_shape=out_shapes,
        grid_spec=pltpu.PrefetchScalarGridSpec(
            num_scalar_prefetch=0,
            grid=(n_steps,),
            in_specs=[
                pl.BlockSpec((Bb, S, D), lambda b: (b, 0, 0)),   # x slab (bf16)
                pl.BlockSpec((D, H),     lambda b: (0, 0)),      # W1
                pl.BlockSpec((1, H),     lambda b: (0, 0)),      # b1
                pl.BlockSpec((1, H),     lambda b: (0, 0)),      # W2 row
            ],
            out_specs=[
                pl.BlockSpec((Bb, D), lambda b: (b, 0)),         # outputs
                pl.BlockSpec((Bb, S), lambda b: (b, 0)),         # weights
            ],
        ),
        compiler_params=pltpu.CompilerParams(
            dimension_semantics=("parallel",),
            vmem_limit_bytes=vmem_limit,
        ),
    )(x_bf, w1_c, b1_2d, w2_row)

    return outputs[:B], weights[:B]


def _reference(x, w1, b1, w2, b2):
    h = jnp.maximum(x @ w1 + b1, 0.0)            # (B, S, H)
    e = (h @ w2 + b2)[..., 0]                    # (B, S)  (b2 included on purpose)
    w = jax.nn.softmax(e, axis=1)                # (B, S)
    out = jnp.sum(x * w[..., None], axis=1)      # (B, D)
    return out, w


if __name__ == "__main__":
    def run_case(B, S, D, H, seed):
        key = jax.random.PRNGKey(seed)
        kx, kw1, kb1, kw2, kb2 = jax.random.split(key, 5)
        x = jax.random.normal(kx,  (B, S, D), dtype=jnp.float32)
        w1 = jax.random.normal(kw1, (D, H),   dtype=jnp.float32) * 0.1
        b1 = jax.random.normal(kb1, (H,),     dtype=jnp.float32) * 0.1
        w2 = jax.random.normal(kw2, (H, 1),   dtype=jnp.float32) * 0.1
        b2 = jax.random.normal(kb2, (1,),     dtype=jnp.float32) * 0.1

        outputs, weights = weighted_attention(x, w1, b1, w2, b2)
        jax.block_until_ready((outputs, weights))

        ref_out, ref_w = _reference(x, w1, b1, w2, b2)
        # bf16 input streaming -> relaxed tolerance vs. the pure-f32 reference.
        np.testing.assert_allclose(np.asarray(outputs), np.asarray(ref_out),
                                   rtol=1e-2, atol=1e-2)
        np.testing.assert_allclose(np.asarray(weights), np.asarray(ref_w),
                                   rtol=1e-2, atol=1e-2)

    # Shapes consistent with the module: input_dim = D, hidden_dim = H.
    run_case(B=2, S=8, D=32, H=16, seed=0)        # f32-matmul path, single grid step
    run_case(B=16, S=16, D=128, H=64, seed=1)     # bf16-matmul path, 2 steps, lane-dense D

    print("KERNEL_OK")
</pallas_src>

<mosaic_0001>
module attributes {stable_mosaic.version = 11 : i64} {
  func.func @_weighted_attention_kernel(%arg0: i32, %arg1: memref<8x8x32xbf16, #tpu.memory_space<vmem>>, %arg2: memref<32x16xf32, #tpu.memory_space<vmem>>, %arg3: memref<1x16xf32, #tpu.memory_space<vmem>>, %arg4: memref<1x16xf32, #tpu.memory_space<vmem>>, %arg5: memref<8x32xf32, #tpu.memory_space<vmem>>, %arg6: memref<8x8xf32, #tpu.memory_space<vmem>>) attributes {dimension_semantics = [#tpu.dimension_semantics<parallel>], iteration_bounds = array<i64: 1>, scalar_prefetch = 0 : i64, scratch_operands = 0 : i64, tpu.core_type = #tpu.core_type<tc>, window_params = [{transform_indices = @transform_0, window_bounds = array<i64: 8, 8, 32>}, {pipeline_mode = #tpu.pipeline_mode<synchronous>, transform_indices = @transform_1, window_bounds = array<i64: 32, 16>}, {pipeline_mode = #tpu.pipeline_mode<synchronous>, transform_indices = @transform_2, window_bounds = array<i64: 1, 16>}, {pipeline_mode = #tpu.pipeline_mode<synchronous>, transform_indices = @transform_3, window_bounds = array<i64: 1, 16>}, {transform_indices = @transform_4, window_bounds = array<i64: 8, 32>}, {transform_indices = @transform_5, window_bounds = array<i64: 8, 8>}]} {
    %c0 = arith.constant 0 : index
    %c0_0 = arith.constant 0 : index
    %c0_1 = arith.constant 0 : index
    %0 = vector.load %arg1[%c0, %c0_0, %c0_1] : memref<8x8x32xbf16, #tpu.memory_space<vmem>>, vector<8x8x32xbf16>
    %1 = arith.extf %0 : vector<8x8x32xbf16> to vector<8x8x32xf32>
    %2 = vector.shape_cast %1 : vector<8x8x32xf32> to vector<64x32xf32>
    %c0_2 = arith.constant 0 : index
    %c0_3 = arith.constant 0 : index
    %3 = vector.load %arg2[%c0_2, %c0_3] : memref<32x16xf32, #tpu.memory_space<vmem>>, vector<32x16xf32>
    %cst = arith.constant dense<0.000000e+00> : vector<64x16xf32>
    %4 = tpu.matmul %2, %3, %cst {dimension_numbers = #tpu.dot_dimension_numbers<[1], [0], [0], [1], [0, 0, 1, 1], [], []>} : vector<64x32xf32>, vector<32x16xf32>, vector<64x16xf32> -> vector<64x16xf32>
    %c0_4 = arith.constant 0 : index
    %c0_5 = arith.constant 0 : index
    %5 = vector.load %arg3[%c0_4, %c0_5] : memref<1x16xf32, #tpu.memory_space<vmem>>, vector<1x16xf32>
    %6 = vector.broadcast %5 : vector<1x16xf32> to vector<64x16xf32>
    %7 = arith.addf %4, %6 : vector<64x16xf32>
    %cst_6 = arith.constant 0.000000e+00 : f32
    %8 = vector.broadcast %cst_6 : f32 to vector<64x16xf32>
    %9 = arith.maximumf %7, %8 : vector<64x16xf32>
    %10 = vector.shape_cast %9 : vector<64x16xf32> to vector<8x8x16xf32>
    %c0_7 = arith.constant 0 : index
    %c0_8 = arith.constant 0 : index
    %11 = vector.load %arg4[%c0_7, %c0_8] : memref<1x16xf32, #tpu.memory_space<vmem>>, vector<1x16xf32>
    %12 = vector.shape_cast %11 : vector<1x16xf32> to vector<1x1x16xf32>
    %13 = vector.broadcast %12 : vector<1x1x16xf32> to vector<8x8x16xf32>
    %14 = arith.mulf %10, %13 : vector<8x8x16xf32>
    %cst_9 = arith.constant dense<0.000000e+00> : vector<8x8xf32>
    %15 = vector.multi_reduction <add>, %14, %cst_9 [2] : vector<8x8x16xf32> to vector<8x8xf32>
    %cst_10 = arith.constant dense<0xFF800000> : vector<8xf32>
    %16 = vector.multi_reduction <maximumf>, %15, %cst_10 [1] : vector<8x8xf32> to vector<8xf32>
    %17 = vector.shape_cast %16 : vector<8xf32> to vector<8x1xf32>
    %18 = vector.broadcast %17 : vector<8x1xf32> to vector<8x8xf32>
    %19 = arith.subf %15, %18 : vector<8x8xf32>
    %20 = math.exp %19 : vector<8x8xf32>
    %cst_11 = arith.constant dense<0.000000e+00> : vector<8xf32>
    %21 = vector.multi_reduction <add>, %20, %cst_11 [1] : vector<8x8xf32> to vector<8xf32>
    %22 = vector.shape_cast %21 : vector<8xf32> to vector<8x1xf32>
    %23 = tpu.reciprocal %22 : vector<8x1xf32> -> vector<8x1xf32>
    %24 = vector.broadcast %23 : vector<8x1xf32> to vector<8x8xf32>
    %25 = arith.mulf %20, %24 : vector<8x8xf32>
    %c0_12 = arith.constant 0 : index
    %c0_13 = arith.constant 0 : index
    %26 = vector.load %arg6[%c0_12, %c0_13] : memref<8x8xf32, #tpu.memory_space<vmem>>, vector<8x8xf32>
    tpu.vector_store %arg6[%c0_12, %c0_13], %25 {strides = array<i32>} : memref<8x8xf32, #tpu.memory_space<vmem>>, vector<8x8xf32>,
    %27 = vector.shape_cast %25 : vector<8x8xf32> to vector<8x8x1xf32>
    %28 = vector.broadcast %27 : vector<8x8x1xf32> to vector<8x8x32xf32>
    %29 = arith.mulf %1, %28 : vector<8x8x32xf32>
    %cst_14 = arith.constant dense<0.000000e+00> : vector<8x32xf32>
    %30 = vector.multi_reduction <add>, %29, %cst_14 [1] : vector<8x8x32xf32> to vector<8x32xf32>
    %c0_15 = arith.constant 0 : index
    %c0_16 = arith.constant 0 : index
    %31 = vector.load %arg5[%c0_15, %c0_16] : memref<8x32xf32, #tpu.memory_space<vmem>>, vector<8x32xf32>
    tpu.vector_store %arg5[%c0_15, %c0_16], %30 {strides = array<i32>} : memref<8x32xf32, #tpu.memory_space<vmem>>, vector<8x32xf32>,
    return
  }
  func.func @transform_0(%arg0: i32) -> (i32, i32, i32) {
    %c0_i32 = arith.constant 0 : i32
    %c0_i32_0 = arith.constant 0 : i32
    %c0_i32_1 = arith.constant 0 : i32
    return %arg0, %c0_i32, %c0_i32_0 : i32, i32, i32
  }
  func.func @transform_1(%arg0: i32) -> (i32, i32) {
    %c0_i32 = arith.constant 0 : i32
    %c0_i32_0 = arith.constant 0 : i32
    %c0_i32_1 = arith.constant 0 : i32
    return %c0_i32, %c0_i32_0 : i32, i32
  }
  func.func @transform_2(%arg0: i32) -> (i32, i32) {
    %c0_i32 = arith.constant 0 : i32
    %c0_i32_0 = arith.constant 0 : i32
    %c0_i32_1 = arith.constant 0 : i32
    return %c0_i32, %c0_i32_0 : i32, i32
  }
  func.func @transform_3(%arg0: i32) -> (i32, i32) {
    %c0_i32 = arith.constant 0 : i32
    %c0_i32_0 = arith.constant 0 : i32
    %c0_i32_1 = arith.constant 0 : i32
    return %c0_i32, %c0_i32_0 : i32, i32
  }
  func.func @transform_4(%arg0: i32) -> (i32, i32) {
    %c0_i32 = arith.constant 0 : i32
    %c0_i32_0 = arith.constant 0 : i32
    return %arg0, %c0_i32 : i32, i32
  }
  func.func @transform_5(%arg0: i32) -> (i32, i32) {
    %c0_i32 = arith.constant 0 : i32
    %c0_i32_0 = arith.constant 0 : i32
    return %arg0, %c0_i32 : i32, i32
  }
}

</mosaic_0001>

<bundles_post_ra>
// kernel: tpu_custom_call.1
= control target key start
LH: loop header
LB: loop body
LE: loop exit
PB: predicated region body
PF: predicated region fallthrough
CT: control target
= control target key end

     0   :  { %11 = vsyncpa [#allocation3], 0  ;;  %vm48_vm0 = vcmask 261120   ;;  %s1071_s0 = inlined_call_operand.vmem [shape: bf16[8,8,32], index: 0, kind: input, shape index: {}]   ;;  %s1072_s1 = inlined_call_operand.vmem [shape: f32[32,16], index: 1, kind: input, shape index: {}]   ;;  %s1073_s2 = inlined_call_operand.vmem [shape: f32[1,16], index: 2, kind: input, shape index: {}]   ;;  %s1074_s3 = inlined_call_operand.vmem [shape: f32[1,16], index: 3, kind: input, shape index: {}]   ;;  %s1075_s4 = inlined_call_operand.hbm [shape: f32[8,32], index: 4, kind: output, shape index: {0}]   ;;  %s1076_s5 = inlined_call_operand.hbm [shape: f32[8,8], index: 5, kind: output, shape index: {1}]  }
   0x1   :  { %v37_v0 = vld [vmem:[%s1072_s1] sm:$0xff]  ;;  %v38_v1 = vld [vmem:[%s1072_s1 + $0x8] sm:$0xff]  ;;  %v39_v2 = vld [vmem:[%s1072_s1 + $0x10] sm:$0xff] }
   0x2   :  { %v728_v3 = vpack.c.bf16 %v38_v1, %v37_v0  ;;  %v40_v4 = vld [vmem:[%s1072_s1 + $0x18] sm:$0xff]  ;;  %v859_v5 = vld [vmem:[%s1071_s0] sm:$0xff]   ;;  %v865_v8 = vld [vmem:[%s1071_s0 + $0x10] sm:$0xff]  }
   0x3   :  { %v732_v6 = vpack.c.bf16 %v40_v4, %v39_v2  ;;  %v679_v7 = vunpack.c.l.bf16 %v859_v5 }
   0x4   :  { %12 = vsyncpa [#allocation5], 0  ;;  %729 = vmatprep.subr.bf16.mxu0 %v728_v3  ;;  %736 = vmatprep.subr.bf16.mxu1 %v728_v3  ;;  %v687_v9 = vunpack.c.l.bf16 %v865_v8  ;;  %v874_v10 = vld [vmem:[%s1071_s0 + $0x8] sm:$0xff]   ;;  %v882_v11 = vld [vmem:[%s1071_s0 + $0x18] sm:$0xff]   ;;  %v680_v12 = vunpack.c.h.bf16 %v859_v5  ;;  %v688_v14 = vunpack.c.h.bf16 %v865_v8  ;;  %vm201_vm1 = vcmask 130048  }
   0x5   :  { %731 = vmatpush3.bf16.msra.mxu0 %v728_v3  ;;  %716 = vmatprep.mubr.msk.f32.mxu0 %vm48_vm0, %v679_v7  ;;  %v683_v13 = vunpack.c.l.bf16 %v874_v10  ;;  %v691_v15 = vunpack.c.l.bf16 %v882_v11  ;;  %v684_v16 = vunpack.c.h.bf16 %v874_v10  ;;  %v692_v17 = vunpack.c.h.bf16 %v882_v11  ;;  %v667_v18 = vld [vmem:[%s1073_s2] ss:$0 sm:$0xff]  ;;  %s812_s2 = smov [#allocation4]  }
   0x6   :  { %733 = vmatprep.subr.bf16.mxu0 %v732_v6  ;;  %738 = vmatpush3.bf16.msra.mxu1 %v728_v3  ;;  %v676_v24 = vld [vmem:[%s1074_s3] ss:$0 sm:$0xff]  ;;  %v234_v60 = vlaneseq  ;;  %vm268_vm2 = vcmask 1041409   ;;  %vm270_vm3 = vcmask 1042434   ;;  %vm272_vm4 = vcmask 1043459   ;;  %s655_s3 = sshll.u32 %s812_s2, 4  ;;  %s656_s3 = int_to_ptr.vmem [resolvable:$true] %s655_s3 }
   0x7   :  { %737 = vmatprep.subr.bf16.mxu1 %v732_v6  ;;  %722 = vmatprep.mubr.msk.f32.mxu1 %vm48_vm0, %v687_v9  ;;  %vm274_vm5 = vcmask 1044484   ;;  %vm276_vm6 = vcmask 1045509   ;;  %vm278_vm7 = vcmask 1046534   ;;  %vm280_vm8 = vcmask 1047559   ;;  %s763_s11 = scalar_lea.vmem %s656_s3, 128  ;;  %p768_p1 = scmp.lt.s32.totalorder %s656_s3, %s656_s3 }
   0x8   :  { %v235_v61 = vand.u32 127, %v234_v60  ;;  %v922_v62 = vshrl.u32 %v234_v60, 7  ;;  %vm283_vm9 = vcmask 64512   ;;  %p764_p0 = scmp.ne.s32.totalorder %s656_s3, %s763_s11  ;;  %p769_p2 = scmp.lt.s32.totalorder %s763_s11, %s763_s11 }
   0x9   :  { %735 = vmatpush3.bf16.msra.mxu0 %v732_v6 }
   0xa   :  { %739 = vmatpush3.bf16.msra.mxu1 %v732_v6  ;;  %v925_v0 = vsub.s32 %v235_v61, %v922_v62  ;;  %v318_v60 = vsub.s32 7, %v922_v62  ;;  %p770_p3 = por %p769_p2, %p768_p1 }
   0xc   :  { %717 = vmatmul.mubr.msk.f32.vlgmr.msra.gmra.mrb[0].mxu0 %vm48_vm0, %v680_v12  ;;  %p771_p4 = pnand %p770_p3, %p764_p0 }
   0xd   :  { %719 = vmatprep.mubr.msk.f32.mxu0 %vm48_vm0, %v683_v13  ;;  %723 = vmatmul.mubr.msk.f32.vlgmr.msra.gmra.mrb[0].mxu1 %vm48_vm0, %v688_v14 }
   0xe   :  { %725 = vmatprep.mubr.msk.f32.mxu1 %vm48_vm0, %v691_v15 }
  0x10   :  { %720 = vmatmul.mubr.msk.f32.gmra.mrb[2].mxu0 %vm48_vm0, %v684_v16 }
  0x11   :  { %726 = vmatmul.mubr.msk.f32.gmra.mrb[2].mxu1 %vm48_vm0, %v692_v17 }
  0xdf   :  { %v718_v19 = vpop.f32.mrb[0].mxu0 }
  0xe0   :  { %v145_v20 = vadd.f32 %v718_v19, %v667_v18  ;;  %v139_v21 = vpop.f32.mrb[1].mxu0  ;;  %v724_v22 = vpop.f32.mrb[0].mxu1 }
  0xe1   :  { %v140_v23 = vadd.f32 %v667_v18, %v139_v21  ;;  %v159_v25 = vpop.f32.mrb[1].mxu1  ;;  %v165_v36 = vadd.f32 %v724_v22, %v667_v18 }
  0xe2   :  { %v179_v26 = vmax.f32 %v145_v20, 0.0  ;;  %v160_v27 = vadd.f32 %v667_v18, %v159_v25 }
  0xe3   :  { %v178_v28 = vmax.f32 %v140_v23, 0.0  ;;  %v721_v29 = vpop.f32.mrb[2].mxu0  ;;  %v183_v46 = vmax.f32 %v165_v36, 0.0  ;;  %v811_v36 = vmov 0  }
  0xe4   :  { %v155_v30 = vadd.f32 %v721_v29, %v667_v18  ;;  %v149_v31 = vpop.f32.mrb[3].mxu0  ;;  %v194_v32 = vmul.f32 %v676_v24, %v179_v26  ;;  %v182_v33 = vmax.f32 %v160_v27, 0.0  ;;  %v727_v34 = vpop.f32.mrb[2].mxu1  ;;  %744 = vset.pattern.permute.xlu0 %v811_v36  ;;  %743 = vset.pattern.permute.xlu1 %v811_v36 }
  0xe5   :  { %v150_v35 = vadd.f32 %v667_v18, %v149_v31  ;;  %v169_v37 = vpop.f32.mrb[3].mxu1  ;;  %v193_v40 = vmul.f32 %v676_v24, %v178_v28  ;;  %v175_v47 = vadd.f32 %v727_v34, %v667_v18  ;;  %v198_v55 = vmul.f32 %v676_v24, %v183_v46 }
  0xe6   :  { %v181_v38 = vmax.f32 %v155_v30, 0.0  ;;  %v205_v39 = vsel %vm201_vm1, %v194_v32, 0.0  ;;  %v170_v41 = vadd.f32 %v667_v18, %v169_v37  ;;  %v197_v45 = vmul.f32 %v676_v24, %v182_v33 }
  0xe7   :  { %v180_v42 = vmax.f32 %v150_v35, 0.0  ;;  %206 = vadd.xlane.f32.xlu0 %v205_v39  ;;  %v202_v49 = vsel %vm201_vm1, %v193_v40, 0.0  ;;  %v185_v53 = vmax.f32 %v175_v47, 0.0  ;;  %v217_v57 = vsel %vm201_vm1, %v198_v55, 0.0 }
  0xe8   :  { %v196_v43 = vmul.f32 %v676_v24, %v181_v38  ;;  %v184_v44 = vmax.f32 %v170_v41, 0.0  ;;  %v214_v51 = vsel %vm201_vm1, %v197_v45, 0.0  ;;  %v290_v37 = vsub.s32 0, %v922_v62 }
  0xe9   :  { %v195_v50 = vmul.f32 %v676_v24, %v180_v42  ;;  %v200_v58 = vmul.f32 %v676_v24, %v185_v53  ;;  %v294_v38 = vsub.s32 1, %v922_v62  ;;  %v298_v39 = vsub.s32 2, %v922_v62 }
  0xea   :  { %v211_v48 = vsel %vm201_vm1, %v196_v43, 0.0  ;;  %v199_v52 = vmul.f32 %v676_v24, %v184_v44  ;;  %v302_v40 = vsub.s32 3, %v922_v62  ;;  %v306_v45 = vsub.s32 4, %v922_v62 }
  0xeb   :  { %212 = vadd.xlane.f32.xlu1 %v211_v48  ;;  %203 = vadd.xlane.f32.xlu0 %v202_v49  ;;  %v208_v54 = vsel %vm201_vm1, %v195_v50, 0.0  ;;  %v223_v59 = vsel %vm201_vm1, %v200_v58, 0.0 }
  0xec   :  { %v220_v56 = vsel %vm201_vm1, %v199_v52, 0.0  ;;  %v310_v52 = vsub.s32 5, %v922_v62 }
  0xef   :  { %209 = vadd.xlane.f32.xlu1 %v208_v54  ;;  %215 = vadd.xlane.f32.xlu0 %v214_v51 }
  0xf3   :  { %218 = vadd.xlane.f32.xlu1 %v217_v57  ;;  %221 = vadd.xlane.f32.xlu0 %v220_v56  ;;  %v314_v56 = vsub.s32 6, %v922_v62 }
  0xf7   :  { %224 = vadd.xlane.f32.xlu1 %v223_v59 }
 0x174   :  { %v207_v63 = vpop.xlane.xlu0 %206 }
 0x175   :  { %v243_v4 = vrot.slane %v207_v63, %v925_v0 }
 0x178   :  { %v213_v1 = vpop.xlane.xlu1 %212  ;;  %v204_v2 = vpop.xlane.xlu0 %203 }
 0x179   :  { %v239_v3 = vrot.slane %v204_v2, %v925_v0  ;;  %v251_v21 = vrot.slane %v213_v1, %v925_v0 }
 0x17b   :  { %v269_v22 = vsel %vm268_vm2, %v243_v4, %v239_v3 }
 0x17c   :  { %v210_v6 = vpop.xlane.xlu1 %209  ;;  %v216_v18 = vpop.xlane.xlu0 %215 }
 0x17d   :  { %v247_v19 = vrot.slane %v210_v6, %v925_v0  ;;  %v255_v20 = vrot.slane %v216_v18, %v925_v0 }
 0x17f   :  { %v271_v23 = vsel %vm270_vm3, %v247_v19, %v269_v22 }
 0x180   :  { %v273_v24 = vsel %vm272_vm4, %v251_v21, %v271_v23  ;;  %v219_v25 = vpop.xlane.xlu1 %218  ;;  %v222_v26 = vpop.xlane.xlu0 %221 }
 0x181   :  { %v275_v27 = vsel %vm274_vm5, %v255_v20, %v273_v24  ;;  %v259_v28 = vrot.slane %v219_v25, %v925_v0  ;;  %v263_v29 = vrot.slane %v222_v26, %v925_v0 }
 0x183   :  { %v277_v30 = vsel %vm276_vm6, %v259_v28, %v275_v27 }
 0x184   :  { %v225_v31 = vpop.xlane.xlu1 %224  ;;  %v279_v33 = vsel %vm278_vm7, %v263_v29, %v277_v30 }
 0x185   :  { %v267_v32 = vrot.slane %v225_v31, %v925_v0 }
 0x187   :  { %v281_v34 = vsel %vm280_vm8, %v267_v32, %v279_v33 }
 0x188   :  { %v284_v35 = vsel %vm283_vm9, %v281_v34, -inf }
 0x189   :  { %285 = vmax.xlane.f32.xlu0 %v284_v35 }
 0x216   :  { %v286_v41 = vpop.xlane.xlu0 %285 }
 0x217   :  { %v291_v42 = vrot.slane %v286_v41, %v290_v37  ;;  %v295_v43 = vrot.slane %v286_v41, %v294_v38  ;;  %v299_v44 = vrot.slane %v286_v41, %v298_v39  ;;  %v303_v46 = vrot.slane %v286_v41, %v302_v40 }
 0x218   :  { %v307_v53 = vrot.slane %v286_v41, %v306_v45  ;;  %v311_v57 = vrot.slane %v286_v41, %v310_v52  ;;  %v315_v61 = vrot.slane %v286_v41, %v314_v56  ;;  %v319_v4 = vrot.slane %v286_v41, %v318_v60 }
 0x219   :  { %v328_v47 = vsub.f32 %v204_v2, %v291_v42  ;;  %v329_v48 = vsub.f32 %v207_v63, %v295_v43  ;;  %v330_v49 = vsub.f32 %v210_v6, %v299_v44  ;;  %v331_v54 = vsub.f32 %v213_v1, %v303_v46 }
 0x21a   :  { %v332_v58 = vsub.f32 %v216_v18, %v307_v53  ;;  %v333_v63 = vsub.f32 %v219_v25, %v311_v57  ;;  %v334_v6 = vsub.f32 %v222_v26, %v315_v61  ;;  %v335_v20 = vsub.f32 %v225_v31, %v319_v4 }
 0x21b   :  { %v336_v50 = vmul.f32 1.442695, %v328_v47  ;;  %v338_v51 = vmul.f32 1.442695, %v329_v48  ;;  %v340_v55 = vmul.f32 1.442695, %v330_v49 }
 0x21c   :  { %v342_v59 = vmul.f32 1.442695, %v331_v54  ;;  %v344_v2 = vmul.f32 1.442695, %v332_v58  ;;  %v346_v19 = vmul.f32 1.442695, %v333_v63 }
 0x21d   :  { %745 = vpow2.f32 %v336_v50  ;;  %v348_v21 = vmul.f32 1.442695, %v334_v6  ;;  %v350_v23 = vmul.f32 1.442695, %v335_v20 }
 0x21e   :  { %747 = vpow2.f32 %v338_v51 }
 0x21f   :  { %749 = vpow2.f32 %v340_v55 }
 0x220   :  { %751 = vpow2.f32 %v342_v59 }
 0x221   :  { %753 = vpow2.f32 %v344_v2 }
 0x222   :  { %755 = vpow2.f32 %v346_v19 }
 0x223   :  { %757 = vpow2.f32 %v348_v21 }
 0x224   :  { %759 = vpow2.f32 %v350_v23 }
 0x227   :  { %v746_v1 = vpop.eup %745 }
 0x228   :  { %v748_v3 = vpop.eup %747  ;;  %361 = vperm.xlu1 %743, %v746_v1  }
 0x229   :  { %364 = vperm.xlu0 %744, %v748_v3   ;;  %v750_v18 = vpop.eup %749 }
 0x22a   :  { %v752_v22 = vpop.eup %751 }
 0x22b   :  { %v754_v24 = vpop.eup %753 }
 0x22c   :  { %367 = vperm.xlu1 %743, %v750_v18   ;;  %v756_v25 = vpop.eup %755 }
 0x22d   :  { %v758_v27 = vpop.eup %757 }
 0x22e   :  { %v760_v26 = vpop.eup %759 }
 0x230   :  { %370 = vperm.xlu1 %743, %v752_v22  }
 0x234   :  { %373 = vperm.xlu1 %743, %v754_v24  }
 0x238   :  { %376 = vperm.xlu1 %743, %v756_v25  }
 0x23c   :  { %379 = vperm.xlu1 %743, %v758_v27  }
 0x240   :  { %382 = vperm.xlu1 %743, %v760_v26  }
 0x2a7   :  { %v362_v28 = vpop.permute.xlu1 %361 }
 0x2a8   :  { %v365_v31 = vpop.permute.xlu0 %364  ;;  %v387_v35 = vrot.slane %v362_v28, %v925_v0 }
 0x2a9   :  { %v391_v34 = vrot.slane %v365_v31, %v925_v0 }
 0x2ab   :  { %v368_v29 = vpop.permute.xlu1 %367  ;;  %v416_v44 = vsel %vm268_vm2, %v391_v34, %v387_v35 }
 0x2ac   :  { %v395_v36 = vrot.slane %v368_v29, %v925_v0 }
 0x2ae   :  { %v417_v47 = vsel %vm270_vm3, %v395_v36, %v416_v44 }
 0x2af   :  { %v371_v30 = vpop.permute.xlu1 %370 }
 0x2b0   :  { %v399_v41 = vrot.slane %v371_v30, %v925_v0 }
 0x2b2   :  { %v418_v49 = vsel %vm272_vm4, %v399_v41, %v417_v47 }
 0x2b3   :  { %v374_v32 = vpop.permute.xlu1 %373 }
 0x2b4   :  { %v403_v42 = vrot.slane %v374_v32, %v925_v0 }
 0x2b6   :  { %v419_v50 = vsel %vm274_vm5, %v403_v42, %v418_v49 }
 0x2b7   :  { %v377_v33 = vpop.permute.xlu1 %376 }
 0x2b8   :  { %v407_v46 = vrot.slane %v377_v33, %v925_v0 }
 0x2ba   :  { %v420_v53 = vsel %vm276_vm6, %v407_v46, %v419_v50 }
 0x2bb   :  { %v380_v43 = vpop.permute.xlu1 %379 }
 0x2bc   :  { %v411_v48 = vrot.slane %v380_v43, %v925_v0 }
 0x2be   :  { %v421_v55 = vsel %vm278_vm7, %v411_v48, %v420_v53 }
 0x2bf   :  { %v383_v51 = vpop.permute.xlu1 %382 }
 0x2c0   :  { %v415_v54 = vrot.slane %v383_v51, %v925_v0 }
 0x2c2   :  { %v422_v57 = vsel %vm280_vm8, %v415_v54, %v421_v55 }
 0x2c3   :  { %v424_v58 = vsel %vm283_vm9, %v422_v57, 0.0 }
 0x2c4   :  { %425 = vadd.xlane.f32.xlu1 %v424_v58 }
 0x351   :  { %v426_v59 = vpop.xlane.xlu1 %425 }
 0x352   :  { %761 = vrcp.f32 %v426_v59 }
 0x35c   :  { %v762_v61 = vpop.eup %761 }
 0x35d   :  { %v432_v63 = vrot.slane %v762_v61, %v290_v37  ;;  %v436_v4 = vrot.slane %v762_v61, %v294_v38  ;;  %v440_v19 = vrot.slane %v762_v61, %v298_v39  ;;  %v444_v21 = vrot.slane %v762_v61, %v302_v40 }
 0x35e   :  { %v448_v28 = vrot.slane %v762_v61, %v306_v45  ;;  %v452_v38 = vrot.slane %v762_v61, %v310_v52  ;;  %v456_v39 = vrot.slane %v762_v61, %v314_v56  ;;  %v460_v40 = vrot.slane %v762_v61, %v318_v60 }
 0x35f   :  { %v469_v2 = vmul.f32 %v746_v1, %v432_v63  ;;  %v470_v6 = vmul.f32 %v748_v3, %v436_v4  ;;  %v471_v20 = vmul.f32 %v750_v18, %v440_v19  ;;  %v472_v23 = vmul.f32 %v752_v22, %v444_v21 }
 0x360   :  { %v473_v37 = vmul.f32 %v754_v24, %v448_v28  ;;  %v474_v1 = vmul.f32 %v756_v25, %v452_v38  ;;  %v475_v3 = vmul.f32 %v758_v27, %v456_v39  ;;  %v476_v18 = vmul.f32 %v760_v26, %v460_v40 }
 0x361   :  { %486 = vperm.xlu0 %744, %v469_v2  }
 0x365   :  { %489 = vperm.xlu0 %744, %v470_v6  }
 0x369   :  { %492 = vperm.xlu0 %744, %v471_v20  }
 0x36d   :  { %495 = vperm.xlu0 %744, %v472_v23  }
 0x371   :  { %498 = vperm.xlu0 %744, %v473_v37  }
 0x375   :  { %501 = vperm.xlu0 %744, %v474_v1  }
 0x379   :  { %504 = vperm.xlu0 %744, %v475_v3  }
 0x37d   :  { %507 = vperm.xlu0 %744, %v476_v18  }
 0x3e0   :  { %v487_v22 = vpop.permute.xlu0 %486 }
 0x3e1   :  { %v558_v52 = vmul.f32 %v679_v7, %v487_v22  ;;  %v512_v44 = vrot.slane %v487_v22, %v925_v0 }
 0x3e3   :  { %v566_v62 = vsel %vm48_vm0, %v558_v52, 0.0 }
 0x3e4   :  { %v490_v45 = vpop.permute.xlu0 %489  ;;  %v567_v32 = vrot.slane %v566_v62, 4 }
 0x3e5   :  { %v559_v24 = vmul.f32 %v680_v12, %v490_v45  ;;  %v516_v10 = vrot.slane %v490_v45, %v925_v0 }
 0x3e6   :  { %v568_v34 = vadd.f32 %v567_v32, %v566_v62 }
 0x3e7   :  { %v573_v27 = vsel %vm48_vm0, %v559_v24, 0.0  ;;  %v541_v8 = vsel %vm268_vm2, %v516_v10, %v512_v44 }
 0x3e8   :  { %v493_v25 = vpop.permute.xlu0 %492  ;;  %v574_v30 = vrot.slane %v573_v27, 4 }
 0x3e9   :  { %v560_v56 = vmul.f32 %v683_v13, %v493_v25  ;;  %v520_v47 = vrot.slane %v493_v25, %v925_v0 }
 0x3ea   :  { %v575_v33 = vadd.f32 %v574_v30, %v573_v27 }
 0x3eb   :  { %v580_v60 = vsel %vm48_vm0, %v560_v56, 0.0  ;;  %v542_v63 = vsel %vm270_vm3, %v520_v47, %v541_v8 }
 0x3ec   :  { %v496_v26 = vpop.permute.xlu0 %495  ;;  %v581_v12 = vrot.slane %v580_v60, 4  ;;  %v576_v46 = vrot.slane %v575_v33, 2 }
 0x3ed   :  { %v561_v29 = vmul.f32 %v684_v16, %v496_v26  ;;  %v524_v50 = vrot.slane %v496_v26, %v925_v0 }
 0x3ee   :  { %v582_v35 = vadd.f32 %v581_v12, %v580_v60  ;;  %v577_v61 = vadd.f32 %v576_v46, %v575_v33 }
 0x3ef   :  { %v587_v5 = vsel %vm48_vm0, %v561_v29, 0.0  ;;  %v543_v20 = vsel %vm272_vm4, %v524_v50, %v542_v63 }
 0x3f0   :  { %v588_v7 = vrot.slane %v587_v5, 4  ;;  %v499_v31 = vpop.permute.xlu0 %498  ;;  %v583_v49 = vrot.slane %v582_v35, 2  ;;  %v578_v18 = vrot.slane %v577_v61, 1 }
 0x3f1   :  { %v562_v13 = vmul.f32 %v687_v9, %v499_v31  ;;  %v569_v9 = vrot.slane %v568_v34, 2  ;;  %v528_v54 = vrot.slane %v499_v31, %v925_v0 }
 0x3f2   :  { %v589_v41 = vadd.f32 %v588_v7, %v587_v5  ;;  %v584_v19 = vadd.f32 %v583_v49, %v582_v35 }
 0x3f3   :  { %v594_v36 = vsel %vm48_vm0, %v562_v13, 0.0  ;;  %v570_v6 = vadd.f32 %v569_v9, %v568_v34  ;;  %v544_v28 = vsel %vm274_vm5, %v528_v54, %v543_v20 }
 0x3f4   :  { %v595_v42 = vrot.slane %v594_v36, 4  ;;  %v502_v43 = vpop.permute.xlu0 %501  ;;  %v590_v53 = vrot.slane %v589_v41, 2  ;;  %v585_v52 = vrot.slane %v584_v19, 1 }
 0x3f5   :  { %v563_v16 = vmul.f32 %v688_v14, %v502_v43  ;;  %v532_v58 = vrot.slane %v502_v43, %v925_v0  ;;  %v571_v27 = vrot.slane %v570_v6, 1 }
 0x3f6   :  { %v596_v48 = vadd.f32 %v595_v42, %v594_v36  ;;  %v591_v23 = vadd.f32 %v590_v53, %v589_v41 }
 0x3f7   :  { %v601_v51 = vsel %vm48_vm0, %v563_v16, 0.0  ;;  %v545_v39 = vsel %vm276_vm6, %v532_v58, %v544_v28 }
 0x3f8   :  { %v602_v55 = vrot.slane %v601_v51, 4  ;;  %v505_v57 = vpop.permute.xlu0 %504  ;;  %v597_v14 = vrot.slane %v596_v48, 2  ;;  %v592_v62 = vrot.slane %v591_v23, 1 }
 0x3f9   :  { %v564_v59 = vmul.f32 %v691_v15, %v505_v57  ;;  %v536_v4 = vrot.slane %v505_v57, %v925_v0 }
 0x3fa   :  { %v603_v2 = vadd.f32 %v602_v55, %v601_v51  ;;  %v598_v1 = vadd.f32 %v597_v14, %v596_v48 }
 0x3fb   :  { %v608_v21 = vsel %vm48_vm0, %v564_v59, 0.0  ;;  %v546_v24 = vsel %vm278_vm7, %v536_v4, %v545_v39 }
 0x3fc   :  { %v604_v37 = vrot.slane %v603_v2, 2  ;;  %v609_v38 = vrot.slane %v608_v21, 4  ;;  %v508_v15 = vpop.permute.xlu0 %507 }
 0x3fd   :  { %v540_v3 = vrot.slane %v508_v15, %v925_v0  ;;  %v565_v40 = vmul.f32 %v692_v17, %v508_v15  ;;  %v599_v0 = vrot.slane %v598_v1, 1 }
 0x3fe   :  { %v605_v22 = vadd.f32 %v604_v37, %v603_v2  ;;  %v610_v45 = vadd.f32 %v609_v38, %v608_v21 }
 0x3ff   :  { %v615_v25 = vsel %vm48_vm0, %v565_v40, 0.0  ;;  %v547_v56 = vsel %vm280_vm8, %v540_v3, %v546_v24 }
 0x400   :  { %v611_v60 = vrot.slane %v610_v45, 2  ;;  %v616_v26 = vrot.slane %v615_v25, 4  ;;  %549 = vst.msk [vmem:[#allocation4] sm:$0xff] %vm283_vm9, %v547_v56 }
 0x401   :  { %774 = shalt.err (!%p771_p4)
}
 0x402   :  { %s775_s14 = scalar_lea.hbm %s1076_s5, 128 }
 0x403   :  { %p776_p5 = scmp.ne.s32.totalorder %s1076_s5, %s775_s14  ;;  %p779_p6 = scmp.lt.u32.totalorder %s775_s14, %s1076_s5 }
 0x405   :  { %p781_p7 = pnand %p779_p6, %p776_p5 }
 0x407   :  { %784 = shalt.err (!%p781_p7)
}
 0x408   :  { %658 = dma.vmem_to_hbm [thread:$0]  %s656_s3, 128, %s1076_s5, [#allocation5]   ;;  %v579_v11 = vadd.f32 %v578_v18, %v577_v61  ;;  %v606_v17 = vrot.slane %v605_v22, 1  ;;  %v612_v29 = vadd.f32 %v611_v60, %v610_v45  ;;  %v617_v30 = vadd.f32 %v616_v26, %v615_v25 }
 0x409   :  { %v586_v32 = vadd.f32 %v585_v52, %v584_v19  ;;  %v572_v12 = vadd.f32 %v571_v27, %v570_v6  ;;  %v593_v5 = vadd.f32 %v592_v62, %v591_v23  ;;  %v600_v13 = vadd.f32 %v599_v0, %v598_v1  ;;  %s813_s5 = smov [#allocation2]  }
 0x40a   :  { %v613_v7 = vrot.slane %v612_v29, 1  ;;  %v618_v31 = vrot.slane %v617_v30, 2  ;;  %v607_v34 = vadd.f32 %v606_v17, %v605_v22  ;;  %s645_s21 = sshll.u32 %s813_s5, 4  ;;  %s646_s21 = int_to_ptr.vmem [resolvable:$true] %s645_s21 }
 0x40b   :  { %v630_v33 = vsel %vm268_vm2, %v579_v11, %v572_v12  ;;  %s785_s22 = scalar_lea.vmem %s646_s21, 128  ;;  %p790_p9 = scmp.lt.s32.totalorder %s646_s21, %s646_s21 }
 0x40c   :  { %v619_v35 = vadd.f32 %v618_v31, %v617_v30  ;;  %v614_v36 = vadd.f32 %v613_v7, %v612_v29  ;;  %v631_v41 = vsel %vm270_vm3, %v586_v32, %v630_v33  ;;  %p786_p8 = scmp.ne.s32.totalorder %s646_s21, %s785_s22  ;;  %p791_p10 = scmp.lt.s32.totalorder %s785_s22, %s785_s22 }
 0x40d   :  { %v632_v43 = vsel %vm272_vm4, %v593_v5, %v631_v41 }
 0x40e   :  { %v620_v42 = vrot.slane %v619_v35, 1  ;;  %v633_v10 = vsel %vm274_vm5, %v600_v13, %v632_v43  ;;  %p792_p11 = por %p791_p10, %p790_p9 }
 0x40f   :  { %v634_v44 = vsel %vm276_vm6, %v607_v34, %v633_v10 }
 0x410   :  { %v621_v16 = vadd.f32 %v620_v42, %v619_v35  ;;  %v635_v46 = vsel %vm278_vm7, %v614_v36, %v634_v44  ;;  %p793_p12 = pnand %p792_p11, %p786_p8 }
 0x412   :  { %v636_v47 = vsel %vm280_vm8, %v621_v16, %v635_v46 }
 0x413   :  { %638 = vst.msk [vmem:[#allocation2] sm:$0xff] %vm48_vm0, %v636_v47 }
 0x414   :  { %796 = shalt.err (!%p793_p12)
}
 0x415   :  { %s797_s25 = scalar_lea.hbm %s1075_s4, 128 }
 0x416   :  { %p798_p13 = scmp.ne.s32.totalorder %s1075_s4, %s797_s25  ;;  %p801_p0 = scmp.lt.u32.totalorder %s797_s25, %s1075_s4 }
 0x418   :  { %p803_p1 = pnand %p801_p0, %p798_p13 }
 0x41a   :  { %806 = shalt.err (!%p803_p1)
}
 0x41b   :  { %648 = dma.vmem_to_hbm [thread:$0]  %s646_s21, 128, %s1075_s4, [#allocation3]  }
 0x41c   :  { %807 = dma.done.wait [#allocation3], 128  }
 0x41d   :  { %808 = vsyncadd [#allocation3], 4294967168 }
 0x41e   :  { %809 = dma.done.wait [#allocation5], 128  }
 0x41f   :  { %810 = vsyncadd [#allocation5], 4294967168 }
 0x420   :  { %665 = vsyncpa [#allocation3], 1 }
 0x421   :  { %666 = vsyncpa [#allocation5], 1 }

</bundles_post_ra>
